<compile_context>
chip_gen: v7x
topology: tpu7x:2x2x1
jax: 0.10.0
libtpu: 0.0.40
codegen_flags: <defaults>
</compile_context>

<pallas_src>
import jax
import jax.numpy as jnp
from jax.experimental import pallas as pl
from jax.experimental.pallas import tpu as pltpu


# ------------------------- kernel -------------------------
def _conv1d_compress_kernel(x_ref, w_ref, b_ref, o_ref):
    # x_ref: [TM, c*D_in]   w_ref: [c*D_in, D_out]   b_ref: [1, D_out]
    # Single MXU matmul over the folded (tap, channel) contraction, f32 accumulate.
    acc = jnp.dot(x_ref[...], w_ref[...], preferred_element_type=jnp.float32)
    o_ref[...] = acc + b_ref[...]


# ------------------------- wrapper -------------------------
def conv1d_compression(mem, weight, bias, *, compute_dtype=None, block_m=256):
    """Conv1dCompression forward.

    mem:    [L, B, D_in]            (PyTorch layout [seq_len, batch, d_model])
    weight: [D_out, D_in, c]        (PyTorch nn.Conv1d weight layout)
    bias:   [D_out]
    returns [L // c, B, D_out] in float32.

    compute_dtype: optional dtype for the matmul operands (e.g. jnp.bfloat16 on
    v6e/v7x); accumulation is always f32.
    """
    assert block_m % 8 == 0
    L, B, D_in = mem.shape
    D_out, D_in2, c = weight.shape
    assert D_in == D_in2
    T = (L - c) // c + 1                     # Conv1d with stride=c drops the remainder
    N = B * T
    K = c * D_in

    # Fold taps into the contraction axis (layout plumbing done once, outside the kernel):
    #   x[b*T + t, j*D_in + i] = mem[t*c + j, b, i]
    #   w[j*D_in + i, o]       = weight[o, i, j]
    x = mem[: T * c].reshape(T, c, B, D_in).transpose(2, 0, 1, 3).reshape(N, K)
    w = jnp.transpose(weight, (2, 1, 0)).reshape(K, D_out)
    b = bias.reshape(1, D_out).astype(jnp.float32)

    if compute_dtype is not None:
        x = x.astype(compute_dtype)
        w = w.astype(compute_dtype)

    # Row tile: full array if small, else a multiple-of-8 tile; last block may be
    # partial (OOB rows are padded on load and masked on store by Pallas).
    tm = N if N <= block_m else block_m
    grid = (pl.cdiv(N, tm),)

    # TODO(synk): for very large d_model (c*D beyond a few K) the contraction axis
    # should also be tiled with a VMEM accumulator; not needed at these sizes.
    out = pl.pallas_call(
        _conv1d_compress_kernel,
        out_shape=jax.ShapeDtypeStruct((N, D_out), jnp.float32),
        grid=grid,
        in_specs=[
            pl.BlockSpec((tm, K), lambda i: (i, 0)),        # row tiles, pipelined
            pl.BlockSpec((K, D_out), lambda i: (0, 0)),     # weight resident across grid
            pl.BlockSpec((1, D_out), lambda i: (0, 0)),     # bias resident across grid
        ],
        out_specs=pl.BlockSpec((tm, D_out), lambda i: (i, 0)),
        compiler_params=pltpu.CompilerParams(
            dimension_semantics=("parallel",)),             # megacore sharding on v7x
    )(x, w, b)

    # [B*T, D_out] -> [T, B, D_out]  (== c_mem.permute(2, 0, 1) in the PyTorch module)
    return out.reshape(B, T, D_out).transpose(1, 0, 2)


# ------------------------- pure-JAX reference (PyTorch semantics) -------------------------
def conv1d_ref(mem, weight, bias):
    D_out, D_in, c = weight.shape
    L = mem.shape[0]
    T = (L - c) // c + 1
    m = mem[: T * c].reshape(T, c, mem.shape[1], D_in)
    return jnp.einsum('tjbi,oij->tbo', m, weight,
                      precision=jax.lax.Precision.HIGHEST) + bias


# ------------------------- main -------------------------
if __name__ == "__main__":
    key = jax.random.PRNGKey(0)
    k1, k2, k3, k4 = jax.random.split(key, 4)

    S, B, D, C = 16, 2, 32, 4   # seq_len, batch, d_model, compression_rate

    # Integer-valued / power-of-two-scaled inputs: exactly representable in bf16,
    # products are multiples of 1/8 and the f32 accumulation is exact, so every
    # matmul precision path gives the bit-exact result and the checks can be tight.
    mem = jax.random.randint(k1, (S, B, D), -4, 5).astype(jnp.float32)
    conv_w = jax.random.randint(k2, (D, D, C), -3, 4).astype(jnp.float32) / 8.0
    conv_b = jax.random.randint(k3, (D,), -8, 9).astype(jnp.float32) / 8.0

    # --- test 1: f32, single block (small shapes) ---
    out = jax.block_until_ready(conv1d_compression(mem, conv_w, conv_b))
    ref = conv1d_ref(mem, conv_w, conv_b)
    assert out.shape == (S // C, B, D)
    assert bool(jnp.allclose(out, ref, atol=1e-5, rtol=1e-5)), "f32 path mismatch"

    # --- test 2: bf16 matmul inputs, multi-step grid with a partial last block,
    #             seq length not a multiple of the compression rate (remainder dropped) ---
    S2, B2 = 174, 3                                  # T_out = 43, N = 129 -> grid of 2
    mem2 = jax.random.randint(k4, (S2, B2, D), -4, 5).astype(jnp.float32)
    out2 = jax.block_until_ready(
        conv1d_compression(mem2, conv_w, conv_b,
                           compute_dtype=jnp.bfloat16, block_m=128))
    ref2 = conv1d_ref(mem2, conv_w, conv_b)
    assert out2.shape == (S2 // C, B2, D)
    assert bool(jnp.allclose(out2, ref2, atol=1e-5, rtol=1e-5)), "bf16 path mismatch"

    print("KERNEL_OK")
</pallas_src>

<mosaic_0001>
module attributes {stable_mosaic.version = 11 : i64} {
  func.func @_conv1d_compress_kernel(%arg0: i32, %arg1: memref<8x128xf32, #tpu.memory_space<vmem>>, %arg2: memref<128x32xf32, #tpu.memory_space<vmem>>, %arg3: memref<1x32xf32, #tpu.memory_space<vmem>>, %arg4: memref<8x32xf32, #tpu.memory_space<vmem>>) attributes {dimension_semantics = [#tpu.dimension_semantics<parallel>], iteration_bounds = array<i64: 1>, scalar_prefetch = 0 : i64, scratch_operands = 0 : i64, tpu.core_type = #tpu.core_type<tc>, window_params = [{transform_indices = @transform_0, window_bounds = array<i64: 8, 128>}, {pipeline_mode = #tpu.pipeline_mode<synchronous>, transform_indices = @transform_1, window_bounds = array<i64: 128, 32>}, {pipeline_mode = #tpu.pipeline_mode<synchronous>, transform_indices = @transform_2, window_bounds = array<i64: 1, 32>}, {transform_indices = @transform_3, window_bounds = array<i64: 8, 32>}]} {
    %c0 = arith.constant 0 : index
    %c0_0 = arith.constant 0 : index
    %0 = vector.load %arg1[%c0, %c0_0] : memref<8x128xf32, #tpu.memory_space<vmem>>, vector<8x128xf32>
    %c0_1 = arith.constant 0 : index
    %c0_2 = arith.constant 0 : index
    %1 = vector.load %arg2[%c0_1, %c0_2] : memref<128x32xf32, #tpu.memory_space<vmem>>, vector<128x32xf32>
    %cst = arith.constant dense<0.000000e+00> : vector<8x32xf32>
    %2 = tpu.matmul %0, %1, %cst {dimension_numbers = #tpu.dot_dimension_numbers<[1], [0], [0], [1], [0, 0, 1, 1], [], []>} : vector<8x128xf32>, vector<128x32xf32>, vector<8x32xf32> -> vector<8x32xf32>
    %c0_3 = arith.constant 0 : index
    %c0_4 = arith.constant 0 : index
    %3 = vector.load %arg3[%c0_3, %c0_4] : memref<1x32xf32, #tpu.memory_space<vmem>>, vector<1x32xf32>
    %4 = vector.broadcast %3 : vector<1x32xf32> to vector<8x32xf32>
    %5 = arith.addf %2, %4 : vector<8x32xf32>
    %c0_5 = arith.constant 0 : index
    %c0_6 = arith.constant 0 : index
    %6 = vector.load %arg4[%c0_5, %c0_6] : memref<8x32xf32, #tpu.memory_space<vmem>>, vector<8x32xf32>
    tpu.vector_store %arg4[%c0_5, %c0_6], %5 {strides = array<i32>} : memref<8x32xf32, #tpu.memory_space<vmem>>, vector<8x32xf32>,
    return
  }
  func.func @transform_0(%arg0: i32) -> (i32, i32) {
    %c0_i32 = arith.constant 0 : i32
    %c0_i32_0 = arith.constant 0 : i32
    return %arg0, %c0_i32 : i32, i32
  }
  func.func @transform_1(%arg0: i32) -> (i32, i32) {
    %c0_i32 = arith.constant 0 : i32
    %c0_i32_0 = arith.constant 0 : i32
    %c0_i32_1 = arith.constant 0 : i32
    return %c0_i32, %c0_i32_0 : i32, i32
  }
  func.func @transform_2(%arg0: i32) -> (i32, i32) {
    %c0_i32 = arith.constant 0 : i32
    %c0_i32_0 = arith.constant 0 : i32
    %c0_i32_1 = arith.constant 0 : i32
    return %c0_i32, %c0_i32_0 : i32, i32
  }
  func.func @transform_3(%arg0: i32) -> (i32, i32) {
    %c0_i32 = arith.constant 0 : i32
    %c0_i32_0 = arith.constant 0 : i32
    return %arg0, %c0_i32 : i32, i32
  }
}

</mosaic_0001>

<bundles_post_ra>
// kernel: tpu_custom_call.1
= control target key start
LH: loop header
LB: loop body
LE: loop exit
PB: predicated region body
PF: predicated region fallthrough
CT: control target
= control target key end

     0   :  { %v230_v3 = vmov 0.0|0.0   ;;  %vm231_vm0 = vmmov 0   ;;  %v232_v6 = vmov 0.0   ;;  %s320_s0 = inlined_call_operand.vmem [shape: f32[8,128], index: 0, kind: input, shape index: {}]   ;;  %s321_s1 = inlined_call_operand.vmem [shape: f32[128,32], index: 1, kind: input, shape index: {}]   ;;  %s322_s2 = inlined_call_operand.vmem [shape: f32[1,32], index: 2, kind: input, shape index: {}]   ;;  %s323_s3 = inlined_call_operand.hbm [shape: f32[8,32], index: 3, kind: output, shape index: {}]  }
   0x1   :  { %v16_v0 = vld [vmem:[%s321_s1] sm:$0xff]  ;;  %v17_v1 = vld [vmem:[%s321_s1 + $0x8] sm:$0xff]  ;;  %v18_v2 = vld [vmem:[%s321_s1 + $0x10] sm:$0xff]  ;;  %178 = vmatprep.subr.bf16.mxu0 %v230_v3  ;;  %175 = vmatprep.mubr.msk.f32.mxu0 %vm231_vm0, %v232_v6 }
   0x2   :  { %v179_v4 = vpack.c.bf16 %v17_v1, %v16_v0  ;;  %v19_v5 = vld [vmem:[%s321_s1 + $0x18] sm:$0xff]  ;;  %v20_v8 = vld [vmem:[%s321_s1 + $0x20] sm:$0xff]  ;;  %v21_v9 = vld [vmem:[%s321_s1 + $0x28] sm:$0xff] }
   0x3   :  { %v182_v7 = vpack.c.bf16 %v19_v5, %v18_v2 }
   0x4   :  { %180 = vmatpush3.bf16.msra.mxu0 %v179_v4 }
   0x5   :  { %181 = vmatprep.subr.bf16.mxu0 %v230_v3 }
   0x6   :  { %8 = vsyncpa [#allocation3], 0  ;;  %v185_v10 = vpack.c.bf16 %v21_v9, %v20_v8  ;;  %v22_v11 = vld [vmem:[%s321_s1 + $0x30] sm:$0xff]  ;;  %v23_v12 = vld [vmem:[%s321_s1 + $0x38] sm:$0xff]  ;;  %s233_s21 = smov [#allocation2]   ;;  %vm109_vm1 = vcmask 261120  }
   0x7   :  { %v188_v13 = vpack.c.bf16 %v23_v12, %v22_v11  ;;  %v24_v14 = vld [vmem:[%s321_s1 + $0x40] sm:$0xff]  ;;  %v25_v15 = vld [vmem:[%s321_s1 + $0x48] sm:$0xff]  ;;  %v26_v17 = vld [vmem:[%s321_s1 + $0x50] sm:$0xff]  ;;  %s117_s22 = sshll.u32 %s233_s21, 4  ;;  %s118_s22 = int_to_ptr.vmem [resolvable:$true] %s117_s22 }
   0x8   :  { %183 = vmatpush3.bf16.msra.mxu0 %v182_v7  ;;  %v191_v16 = vpack.c.bf16 %v25_v15, %v24_v14  ;;  %v27_v18 = vld [vmem:[%s321_s1 + $0x58] sm:$0xff]  ;;  %v28_v20 = vld [vmem:[%s321_s1 + $0x60] sm:$0xff]  ;;  %v29_v21 = vld [vmem:[%s321_s1 + $0x68] sm:$0xff]  ;;  %p211_p1 = scmp.lt.s32.totalorder %s118_s22, %s118_s22 }
   0x9   :  { %184 = vmatprep.subr.bf16.mxu0 %v230_v3  ;;  %v194_v19 = vpack.c.bf16 %v27_v18, %v26_v17  ;;  %v197_v22 = vpack.c.bf16 %v29_v21, %v28_v20  ;;  %v30_v23 = vld [vmem:[%s321_s1 + $0x70] sm:$0xff]  ;;  %v31_v24 = vld [vmem:[%s321_s1 + $0x78] sm:$0xff]  ;;  %v15_v26 = vld [vmem:[%s320_s0] sm:$0xff]  ;;  %s206_s1 = scalar_lea.vmem %s118_s22, 128 }
   0xa   :  { %v200_v25 = vpack.c.bf16 %v31_v24, %v30_v23  ;;  %v125_v27 = vld [vmem:[%s322_s2] ss:$0 sm:$0xff]  ;;  %p207_p0 = scmp.ne.s32.totalorder %s118_s22, %s206_s1  ;;  %p212_p2 = scmp.lt.s32.totalorder %s206_s1, %s206_s1 }
   0xc   :  { %186 = vmatpush3.bf16.msra.mxu0 %v185_v10  ;;  %p213_p3 = por %p212_p2, %p211_p1 }
   0xd   :  { %187 = vmatprep.subr.bf16.mxu0 %v230_v3 }
   0xe   :  { %p214_p4 = pnand %p213_p3, %p207_p0 }
  0x10   :  { %189 = vmatpush3.bf16.msra.mxu0 %v188_v13 }
  0x11   :  { %190 = vmatprep.subr.bf16.mxu0 %v230_v3 }
  0x14   :  { %192 = vmatpush3.bf16.msra.mxu0 %v191_v16 }
  0x15   :  { %193 = vmatprep.subr.bf16.mxu0 %v230_v3 }
  0x18   :  { %195 = vmatpush3.bf16.msra.mxu0 %v194_v19 }
  0x19   :  { %196 = vmatprep.subr.bf16.mxu0 %v230_v3 }
  0x1c   :  { %198 = vmatpush3.bf16.msra.mxu0 %v197_v22 }
  0x1d   :  { %199 = vmatprep.subr.bf16.mxu0 %v230_v3 }
  0x20   :  { %201 = vmatpush3.bf16.msra.mxu0 %v200_v25 }
  0x23   :  { %176 = vmatmul.mubr.f32.vlgmr.msra.gmra.mrb[0].mxu0 %v15_v26 }
  0xf6   :  { %v105_v28 = vpop.f32.mrb[0].mxu0 }
  0xf7   :  { %v106_v29 = vadd.f32 %v125_v27, %v105_v28  ;;  %v177_v30 = vpop.f32.mrb[1].mxu0 }
  0xf9   :  { %110 = vst.msk [vmem:[#allocation2] sm:$0xff] %vm109_vm1, %v106_v29 }
  0xfa   :  { %217 = shalt.err (!%p214_p4)
}
  0xfb   :  { %s218_s24 = scalar_lea.hbm %s323_s3, 128 }
  0xfc   :  { %p219_p5 = scmp.ne.s32.totalorder %s323_s3, %s218_s24  ;;  %p222_p6 = scmp.lt.u32.totalorder %s218_s24, %s323_s3 }
  0xfe   :  { %p224_p7 = pnand %p222_p6, %p219_p5 }
 0x100   :  { %227 = shalt.err (!%p224_p7)
}
 0x101   :  { %120 = dma.vmem_to_hbm [thread:$0]  %s118_s22, 128, %s323_s3, [#allocation3]  }
 0x102   :  { %228 = dma.done.wait [#allocation3], 128  }
 0x103   :  { %229 = vsyncadd [#allocation3], 4294967168 }
 0x104   :  { %124 = vsyncpa [#allocation3], 1 }

</bundles_post_ra>
